<compile_context>
chip_gen: v6e
topology: v6e:2x2x1
jax: 0.10.0
libtpu: 0.0.40
codegen_flags: <defaults>
</compile_context>

<pallas_src>
import functools

import jax
import jax.numpy as jnp
from jax.experimental import pallas as pl
from jax.experimental.pallas import tpu as pltpu


# ---------------------------------------------------------------------------
# Phase 1: global average pool + squeeze-excite (two 1x1 convs) -> s:(N, 1, C)
# ---------------------------------------------------------------------------
def _pool_se_kernel(x_ref, w1_ref, b1_ref, w2_ref, b2_ref, s_ref, acc_ref,
                    *, inv_hw):
    # x_ref:  (BN, C, HW_TILE)   streamed spatial tile of x
    # w1_ref: (C, Cr)  b1_ref: (1, Cr)  w2_ref: (Cr, C)  b2_ref: (1, C)
    # s_ref:  (BN, 1, C)         channel attention output (resident over t)
    # acc_ref:(BN, C) f32        running spatial sum
    t = pl.program_id(1)

    @pl.when(t == 0)
    def _():
        acc_ref[...] = jnp.zeros_like(acc_ref)

    # Accumulate the spatial sum in f32 (correct even for bf16-streamed x).
    acc_ref[...] += jnp.sum(x_ref[...].astype(jnp.float32), axis=-1)

    @pl.when(t == pl.num_programs(1) - 1)
    def _():
        pooled = acc_ref[...] * inv_hw                                # (BN, C)
        # Conv2d(C, Cr, 1) + ReLU  (1x1 conv on a pooled 1x1 map == matmul)
        h = jnp.dot(pooled, w1_ref[...],
                    preferred_element_type=jnp.float32) + b1_ref[...]
        h = jnp.maximum(h, 0.0)                                       # (BN, Cr)
        # Conv2d(Cr, C, 1) + Sigmoid
        s = jnp.dot(h, w2_ref[...],
                    preferred_element_type=jnp.float32) + b2_ref[...]
        s = jax.nn.sigmoid(s)                                         # (BN, C)
        s_ref[...] = s[:, None, :].astype(s_ref.dtype)


# ---------------------------------------------------------------------------
# Phase 2: channel-wise rescale, streamed over lane-dense spatial tiles.
# ---------------------------------------------------------------------------
def _rescale_kernel(s_ref, x_ref, o_ref):
    # s_ref: (BN, 1, C) f32    x_ref / o_ref: (BN, C, HW_TILE)
    scale = s_ref[...][:, 0, :, None]                                 # (BN, C, 1)
    o_ref[...] = (x_ref[...].astype(jnp.float32) * scale).astype(o_ref.dtype)


# ---------------------------------------------------------------------------
# Wrapper
# ---------------------------------------------------------------------------
def _ceil_to(a, m):
    return -(-a // m) * m


def _choose_tiles(N, C, HW, itemsize, target_bytes=2 * 1024 * 1024):
    """Pick (BN, HW_TILE, padded_HW): lane-dense (multiple-of-128) spatial
    tiles of ~target_bytes, and as many batch samples per grid step as fit."""
    bytes_per_col = max(1, C * itemsize)
    cols = (target_bytes // bytes_per_col) // 128 * 128
    cols = max(128, cols)
    hw_tile = min(cols, _ceil_to(HW, 128))
    padded_hw = _ceil_to(HW, hw_tile)
    bn = 1
    for d in range(N, 0, -1):
        if N % d == 0 and d * C * hw_tile * itemsize <= target_bytes:
            bn = d
            break
    return bn, hw_tile, padded_hw


def ca_layer(x, w1, b1, w2, b2):
    """CALayer forward. x: (N, C, H, W), float32 or bfloat16.
    Weights follow PyTorch conv shapes:
      w1: (Cr, C, 1, 1), b1: (Cr,), w2: (C, Cr, 1, 1), b2: (C,)."""
    N, C, H, W = x.shape
    Cr = w1.shape[0]
    HW = H * W
    itemsize = jnp.dtype(x.dtype).itemsize

    bn, hw_tile, padded_hw = _choose_tiles(N, C, HW, itemsize)
    n_n = N // bn
    n_hw = padded_hw // hw_tile

    x_flat = x.reshape(N, C, HW)
    if padded_hw != HW:
        # Zero padding: zeros do not perturb the spatial sum (the mean divides
        # by the true HW) and the padded output columns are sliced off below.
        x_flat = jnp.pad(x_flat, ((0, 0), (0, 0), (0, padded_hw - HW)))

    # 1x1-conv weights -> plain matmul weights (f32 for the tiny SE math).
    w1_m = w1.reshape(Cr, C).T.astype(jnp.float32)   # (C, Cr)
    w2_m = w2.reshape(C, Cr).T.astype(jnp.float32)   # (Cr, C)
    b1_m = b1.reshape(1, Cr).astype(jnp.float32)
    b2_m = b2.reshape(1, C).astype(jnp.float32)

    # --- Phase 1: pooled channel stats + squeeze-excite -> s:(N, 1, C) f32 ---
    s = pl.pallas_call(
        functools.partial(_pool_se_kernel, inv_hw=1.0 / HW),
        out_shape=jax.ShapeDtypeStruct((N, 1, C), jnp.float32),
        grid_spec=pltpu.PrefetchScalarGridSpec(
            num_scalar_prefetch=0,
            grid=(n_n, n_hw),
            in_specs=[
                pl.BlockSpec((bn, C, hw_tile), lambda n, t: (n, 0, t)),
                pl.BlockSpec((C, Cr), lambda n, t: (0, 0)),
                pl.BlockSpec((1, Cr), lambda n, t: (0, 0)),
                pl.BlockSpec((Cr, C), lambda n, t: (0, 0)),
                pl.BlockSpec((1, C), lambda n, t: (0, 0)),
            ],
            out_specs=pl.BlockSpec((bn, 1, C), lambda n, t: (n, 0, 0)),
            scratch_shapes=[pltpu.VMEM((bn, C), jnp.float32)],
        ),
        compiler_params=pltpu.CompilerParams(
            dimension_semantics=("parallel", "arbitrary")),
    )(x_flat, w1_m, b1_m, w2_m, b2_m)

    # --- Phase 2: x * s, streamed in lane-dense tiles, fully parallel grid ---
    out_flat = pl.pallas_call(
        _rescale_kernel,
        out_shape=jax.ShapeDtypeStruct((N, C, padded_hw), x.dtype),
        grid_spec=pltpu.PrefetchScalarGridSpec(
            num_scalar_prefetch=0,
            grid=(n_n, n_hw),
            in_specs=[
                pl.BlockSpec((bn, 1, C), lambda n, t: (n, 0, 0)),
                pl.BlockSpec((bn, C, hw_tile), lambda n, t: (n, 0, t)),
            ],
            out_specs=pl.BlockSpec((bn, C, hw_tile), lambda n, t: (n, 0, t)),
        ),
        compiler_params=pltpu.CompilerParams(
            dimension_semantics=("parallel", "parallel")),
    )(s, x_flat)

    if padded_hw != HW:
        out_flat = out_flat[:, :, :HW]
    return out_flat.reshape(N, C, H, W)


def ca_layer_ref(x, w1, b1, w2, b2):
    """Pure-JAX reference matching the PyTorch forward (f32 math)."""
    N, C, H, W = x.shape
    Cr = w1.shape[0]
    xf = x.astype(jnp.float32)
    pooled = jnp.mean(xf, axis=(2, 3))                                # (N, C)
    h = jnp.maximum(pooled @ w1.reshape(Cr, C).T + b1, 0.0)           # (N, Cr)
    s = jax.nn.sigmoid(h @ w2.reshape(C, Cr).T + b2)                  # (N, C)
    return xf * s[:, :, None, None]


if __name__ == "__main__":
    # Small shapes consistent with the module (channels divisible by reduction).
    N, C, H, W = 2, 32, 16, 16
    reduction = 4
    Cr = C // reduction

    key = jax.random.PRNGKey(0)
    kx, k1, k2, k3, k4 = jax.random.split(key, 5)

    x = jax.random.normal(kx, (N, C, H, W), dtype=jnp.float32)
    w1 = 0.1 * jax.random.normal(k1, (Cr, C, 1, 1), dtype=jnp.float32)
    b1 = 0.1 * jax.random.normal(k2, (Cr,), dtype=jnp.float32)
    w2 = 0.1 * jax.random.normal(k3, (C, Cr, 1, 1), dtype=jnp.float32)
    b2 = 0.1 * jax.random.normal(k4, (C,), dtype=jnp.float32)

    # f32 path (exact match vs reference).
    out = ca_layer(x, w1, b1, w2, b2)
    jax.block_until_ready(out)
    ref = ca_layer_ref(x, w1, b1, w2, b2)
    assert jnp.allclose(out, ref, atol=1e-5, rtol=1e-5), "f32 mismatch vs reference"

    # bf16-streamed I/O path (halves HBM traffic; in-kernel compute stays f32).
    x_bf16 = x.astype(jnp.bfloat16)
    out_bf16 = ca_layer(x_bf16, w1, b1, w2, b2)
    jax.block_until_ready(out_bf16)
    ref_bf16 = ca_layer_ref(x_bf16, w1, b1, w2, b2)
    assert jnp.allclose(out_bf16.astype(jnp.float32), ref_bf16,
                        atol=5e-2, rtol=5e-2), "bf16 mismatch vs reference"

    print("KERNEL_OK")
</pallas_src>

<mosaic_0001>
module attributes {stable_mosaic.version = 11 : i64} {
  func.func @_pool_se_kernel(%arg0: i32, %arg1: i32, %arg2: memref<2x32x256xf32, #tpu.memory_space<vmem>>, %arg3: memref<32x8xf32, #tpu.memory_space<vmem>>, %arg4: memref<1x8xf32, #tpu.memory_space<vmem>>, %arg5: memref<8x32xf32, #tpu.memory_space<vmem>>, %arg6: memref<1x32xf32, #tpu.memory_space<vmem>>, %arg7: memref<2x1x32xf32, #tpu.memory_space<vmem>>, %arg8: memref<2x32xf32, #tpu.memory_space<vmem>>) attributes {dimension_semantics = [#tpu.dimension_semantics<parallel>, #tpu.dimension_semantics<arbitrary>], iteration_bounds = array<i64: 1, 1>, scalar_prefetch = 0 : i64, scratch_operands = 1 : i64, tpu.core_type = #tpu.core_type<tc>, window_params = [{transform_indices = @transform_0, window_bounds = array<i64: 2, 32, 256>}, {pipeline_mode = #tpu.pipeline_mode<synchronous>, transform_indices = @transform_1, window_bounds = array<i64: 32, 8>}, {pipeline_mode = #tpu.pipeline_mode<synchronous>, transform_indices = @transform_2, window_bounds = array<i64: 1, 8>}, {pipeline_mode = #tpu.pipeline_mode<synchronous>, transform_indices = @transform_3, window_bounds = array<i64: 8, 32>}, {pipeline_mode = #tpu.pipeline_mode<synchronous>, transform_indices = @transform_4, window_bounds = array<i64: 1, 32>}, {transform_indices = @transform_5, window_bounds = array<i64: 2, 1, 32>}]} {
    %c0_i32 = arith.constant 0 : i32
    %0 = arith.cmpi eq, %arg1, %c0_i32 : i32
    %1 = arith.extui %0 : i1 to i32
    %c0_i32_0 = arith.constant 0 : i32
    %2 = arith.cmpi ne, %1, %c0_i32_0 : i32
    scf.if %2 {
      %cst_9 = arith.constant 0.000000e+00 : f32
      %11 = vector.broadcast %cst_9 : f32 to vector<2x32xf32>
      %c0_10 = arith.constant 0 : index
      %c0_11 = arith.constant 0 : index
      %12 = vector.load %arg8[%c0_10, %c0_11] : memref<2x32xf32, #tpu.memory_space<vmem>>, vector<2x32xf32>
      tpu.vector_store %arg8[%c0_10, %c0_11], %11 {strides = array<i32>} : memref<2x32xf32, #tpu.memory_space<vmem>>, vector<2x32xf32>,
    } else {
    }
    %c0 = arith.constant 0 : index
    %c0_1 = arith.constant 0 : index
    %3 = vector.load %arg8[%c0, %c0_1] : memref<2x32xf32, #tpu.memory_space<vmem>>, vector<2x32xf32>
    %c0_2 = arith.constant 0 : index
    %c0_3 = arith.constant 0 : index
    %c0_4 = arith.constant 0 : index
    %4 = vector.load %arg2[%c0_2, %c0_3, %c0_4] : memref<2x32x256xf32, #tpu.memory_space<vmem>>, vector<2x32x256xf32>
    %cst = arith.constant dense<0.000000e+00> : vector<2x32xf32>
    %5 = vector.multi_reduction <add>, %4, %cst [2] : vector<2x32x256xf32> to vector<2x32xf32>
    %6 = arith.addf %3, %5 : vector<2x32xf32>
    %c0_5 = arith.constant 0 : index
    %c0_6 = arith.constant 0 : index
    %7 = vector.load %arg8[%c0_5, %c0_6] : memref<2x32xf32, #tpu.memory_space<vmem>>, vector<2x32xf32>
    tpu.vector_store %arg8[%c0_5, %c0_6], %6 {strides = array<i32>} : memref<2x32xf32, #tpu.memory_space<vmem>>, vector<2x32xf32>,
    %c0_i32_7 = arith.constant 0 : i32
    %8 = arith.cmpi eq, %arg1, %c0_i32_7 : i32
    %9 = arith.extui %8 : i1 to i32
    %c0_i32_8 = arith.constant 0 : i32
    %10 = arith.cmpi ne, %9, %c0_i32_8 : i32
    scf.if %10 {
      %c0_9 = arith.constant 0 : index
      %c0_10 = arith.constant 0 : index
      %11 = vector.load %arg8[%c0_9, %c0_10] : memref<2x32xf32, #tpu.memory_space<vmem>>, vector<2x32xf32>
      %cst_11 = arith.constant 3.906250e-03 : f32
      %12 = vector.broadcast %cst_11 : f32 to vector<2x32xf32>
      %13 = arith.mulf %11, %12 : vector<2x32xf32>
      %c0_12 = arith.constant 0 : index
      %c0_13 = arith.constant 0 : index
      %14 = vector.load %arg3[%c0_12, %c0_13] : memref<32x8xf32, #tpu.memory_space<vmem>>, vector<32x8xf32>
      %cst_14 = arith.constant dense<0.000000e+00> : vector<2x8xf32>
      %15 = tpu.matmul %13, %14, %cst_14 {dimension_numbers = #tpu.dot_dimension_numbers<[1], [0], [0], [1], [0, 0, 1, 1], [], []>} : vector<2x32xf32>, vector<32x8xf32>, vector<2x8xf32> -> vector<2x8xf32>
      %c0_15 = arith.constant 0 : index
      %c0_16 = arith.constant 0 : index
      %16 = vector.load %arg4[%c0_15, %c0_16] : memref<1x8xf32, #tpu.memory_space<vmem>>, vector<1x8xf32>
      %17 = vector.broadcast %16 : vector<1x8xf32> to vector<2x8xf32>
      %18 = arith.addf %15, %17 : vector<2x8xf32>
      %cst_17 = arith.constant 0.000000e+00 : f32
      %19 = vector.broadcast %cst_17 : f32 to vector<2x8xf32>
      %20 = arith.maximumf %18, %19 : vector<2x8xf32>
      %c0_18 = arith.constant 0 : index
      %c0_19 = arith.constant 0 : index
      %21 = vector.load %arg5[%c0_18, %c0_19] : memref<8x32xf32, #tpu.memory_space<vmem>>, vector<8x32xf32>
      %cst_20 = arith.constant dense<0.000000e+00> : vector<2x32xf32>
      %22 = tpu.matmul %20, %21, %cst_20 {dimension_numbers = #tpu.dot_dimension_numbers<[1], [0], [0], [1], [0, 0, 1, 1], [], []>} : vector<2x8xf32>, vector<8x32xf32>, vector<2x32xf32> -> vector<2x32xf32>
      %c0_21 = arith.constant 0 : index
      %c0_22 = arith.constant 0 : index
      %23 = vector.load %arg6[%c0_21, %c0_22] : memref<1x32xf32, #tpu.memory_space<vmem>>, vector<1x32xf32>
      %24 = vector.broadcast %23 : vector<1x32xf32> to vector<2x32xf32>
      %25 = arith.addf %22, %24 : vector<2x32xf32>
      %26 = arith.negf %25 : vector<2x32xf32>
      %27 = math.exp %26 : vector<2x32xf32>
      %cst_23 = arith.constant 1.000000e+00 : f32
      %28 = vector.broadcast %cst_23 : f32 to vector<2x32xf32>
      %29 = arith.addf %28, %27 : vector<2x32xf32>
      %30 = arith.divf %28, %29 : vector<2x32xf32>
      %31 = vector.shape_cast %30 : vector<2x32xf32> to vector<2x1x32xf32>
      %c0_24 = arith.constant 0 : index
      %c0_25 = arith.constant 0 : index
      %c0_26 = arith.constant 0 : index
      %32 = vector.load %arg7[%c0_24, %c0_25, %c0_26] : memref<2x1x32xf32, #tpu.memory_space<vmem>>, vector<2x1x32xf32>
      tpu.vector_store %arg7[%c0_24, %c0_25, %c0_26], %31 {strides = array<i32>} : memref<2x1x32xf32, #tpu.memory_space<vmem>>, vector<2x1x32xf32>,
    } else {
    }
    return
  }
  func.func @transform_0(%arg0: i32, %arg1: i32) -> (i32, i32, i32) {
    %c0_i32 = arith.constant 0 : i32
    %c0_i32_0 = arith.constant 0 : i32
    return %arg0, %c0_i32, %arg1 : i32, i32, i32
  }
  func.func @transform_1(%arg0: i32, %arg1: i32) -> (i32, i32) {
    %c0_i32 = arith.constant 0 : i32
    %c0_i32_0 = arith.constant 0 : i32
    %c0_i32_1 = arith.constant 0 : i32
    return %c0_i32, %c0_i32_0 : i32, i32
  }
  func.func @transform_2(%arg0: i32, %arg1: i32) -> (i32, i32) {
    %c0_i32 = arith.constant 0 : i32
    %c0_i32_0 = arith.constant 0 : i32
    %c0_i32_1 = arith.constant 0 : i32
    return %c0_i32, %c0_i32_0 : i32, i32
  }
  func.func @transform_3(%arg0: i32, %arg1: i32) -> (i32, i32) {
    %c0_i32 = arith.constant 0 : i32
    %c0_i32_0 = arith.constant 0 : i32
    %c0_i32_1 = arith.constant 0 : i32
    return %c0_i32, %c0_i32_0 : i32, i32
  }
  func.func @transform_4(%arg0: i32, %arg1: i32) -> (i32, i32) {
    %c0_i32 = arith.constant 0 : i32
    %c0_i32_0 = arith.constant 0 : i32
    %c0_i32_1 = arith.constant 0 : i32
    return %c0_i32, %c0_i32_0 : i32, i32
  }
  func.func @transform_5(%arg0: i32, %arg1: i32) -> (i32, i32, i32) {
    %c0_i32 = arith.constant 0 : i32
    %c0_i32_0 = arith.constant 0 : i32
    %c0_i32_1 = arith.constant 0 : i32
    return %arg0, %c0_i32, %c0_i32_0 : i32, i32, i32
  }
}

</mosaic_0001>

<bundles_post_ra>
// kernel: tpu_custom_call.1
= control target key start
LH: loop header
LB: loop body
LE: loop exit
PB: predicated region body
PF: predicated region fallthrough
CT: control target
= control target key end

     0   :  { %10 = vsyncpa [#allocation4], 0  ;;  %s520_s0 = inlined_call_operand.hbm [shape: f32[2,32,256], index: 0, kind: input, shape index: {}]   ;;  %s521_s1 = inlined_call_operand.vmem [shape: f32[32,8], index: 1, kind: input, shape index: {}]   ;;  %s522_s2 = inlined_call_operand.vmem [shape: f32[1,8], index: 2, kind: input, shape index: {}]   ;;  %s523_s3 = inlined_call_operand.vmem [shape: f32[8,32], index: 3, kind: input, shape index: {}]   ;;  %s524_s4 = inlined_call_operand.vmem [shape: f32[1,32], index: 4, kind: input, shape index: {}]   ;;  %s525_s5 = inlined_call_operand.hbm [shape: f32[2,1,32], index: 5, kind: output, shape index: {}]  }
   0x1   :  { %11 = vsyncpa [#allocation5], 0  ;;  %s450_s18 = smov [#allocation3]  }
   0x2   :  { %s17_s19 = sshll.u32 %s450_s18, 4  ;;  %s18_s19 = int_to_ptr.vmem [resolvable:$true] %s17_s19 }
   0x3   :  { %s414_s20 = scalar_lea.vmem %s18_s19, 2048  ;;  %p419_p1 = scmp.lt.s32.totalorder %s18_s19, %s18_s19 }
   0x4   :  { %p415_p0 = scmp.ne.s32.totalorder %s18_s19, %s414_s20  ;;  %p420_p2 = scmp.lt.s32.totalorder %s414_s20, %s414_s20 }
   0x6   :  { %p421_p3 = por %p420_p2, %p419_p1 }
   0x8   :  { %p422_p4 = pnand %p421_p3, %p415_p0 }
   0xa   :  { %425 = shalt.err (!%p422_p4)
}
   0xb   :  { %s451_s21 = smov 256   ;;  %s452_s22 = smov 16  }
   0xc   :  { %23 = dma.hbm_to_vmem [thread:$0]  %s520_s0, 2048, %s18_s19, [#allocation4], %s451_s21, %s451_s21, %s452_s22  }
   0xd   :  { %446 = dma.done.wait [#allocation4], 2048  }
   0xe   :  { %447 = vsyncadd [#allocation4], 4294965248  ;;  %v50_v0 = vld [vmem:[#allocation3 + $0x40] sm:$0xff]  ;;  %v51_v1 = vld [vmem:[#allocation3 + $0x48] sm:$0xff]  ;;  %vm39_vm0 = vcmask 254976   ;;  %v453_v24 = vmov 0.0   ;;  %v90_v29 = vlaneseq }
   0xf   :  { %v42_v2 = vld [vmem:[#allocation3] sm:$0xff]  ;;  %v70_v3 = vadd.f32 %v51_v1, %v50_v0  ;;  %v43_v4 = vld [vmem:[#allocation3 + $0x8] sm:$0xff]  ;;  %v52_v5 = vld [vmem:[#allocation3 + $0x50] sm:$0xff]  ;;  %40 = vst.msk [vmem:[#allocation2] sm:$0x3] %vm39_vm0, %v453_v24  ;;  %378 = vmatprep.subr.mxu0 %v453_v24  ;;  %389 = vmatprep.subr.mxu1 %v453_v24  ;;  %vm454_vm1 = vmmov 0  }
  0x10   :  { %v53_v6 = vld [vmem:[#allocation3 + $0x58] sm:$0xff]  ;;  %v58_v7 = vadd.f32 %v43_v4, %v42_v2  ;;  %v44_v8 = vld [vmem:[#allocation3 + $0x10] sm:$0xff]  ;;  %v54_v12 = vld [vmem:[#allocation3 + $0x60] sm:$0xff]  ;;  %386 = vmatprep.mubr.msk.f32.mxu0 %vm454_vm1, %v453_v24  ;;  %391 = vmatprep.mubr.msk.f32.mxu1 %vm454_vm1, %v453_v24  ;;  %v91_v30 = vand.u32 127, %v90_v29  ;;  %v93_v35 = vshrl.u32 %v90_v29, 7  ;;  %vm101_vm2 = vcmask 130112  }
  0x11   :  { %v45_v9 = vld [vmem:[#allocation3 + $0x18] sm:$0xff]  ;;  %71 = vadd.xlane.f32.xlu1 %v70_v3  ;;  %v73_v10 = vadd.f32 %v53_v6, %v52_v5  ;;  %v55_v13 = vld [vmem:[#allocation3 + $0x68] sm:$0xff]  ;;  %v46_v14 = vld [vmem:[#allocation3 + $0x20] sm:$0xff]  ;;  %vm108_vm3 = vcmask 195712   ;;  %vm115_vm4 = vcmask 261312   ;;  %vm136_vm5 = vcmask 1041409  }
  0x12   :  { %59 = vadd.xlane.f32.xlu0 %v58_v7  ;;  %v61_v11 = vadd.f32 %v45_v9, %v44_v8  ;;  %v47_v15 = vld [vmem:[#allocation3 + $0x28] sm:$0xff]  ;;  %v76_v16 = vadd.f32 %v55_v13, %v54_v12  ;;  %v56_v18 = vld [vmem:[#allocation3 + $0x70] sm:$0xff]  ;;  %v57_v19 = vld [vmem:[#allocation3 + $0x78] sm:$0xff]  ;;  %v96_v33 = vadd.s32 4294967288, %v91_v30  ;;  %v103_v34 = vadd.s32 4294967280, %v91_v30 }
  0x13   :  { %v64_v17 = vadd.f32 %v47_v15, %v46_v14  ;;  %v48_v20 = vld [vmem:[#allocation3 + $0x30] sm:$0xff]  ;;  %v49_v21 = vld [vmem:[#allocation3 + $0x38] sm:$0xff]  ;;  %v79_v22 = vadd.f32 %v57_v19, %v56_v18  ;;  %v148_v27 = vld [vmem:[%s521_s1 + $0x8] sm:$0xff]  ;;  %v110_v39 = vadd.s32 4294967272, %v91_v30  ;;  %v94_v41 = vsub.s32 %v91_v30, %v93_v35 }
  0x14   :  { %v67_v23 = vadd.f32 %v49_v21, %v48_v20  ;;  %v150_v25 = vld [vmem:[%s521_s1 + $0x18] sm:$0xff]  ;;  %v149_v26 = vld [vmem:[%s521_s1 + $0x10] sm:$0xff]  ;;  %v147_v28 = vld [vmem:[%s521_s1] sm:$0xff]  ;;  %v99_v37 = vsub.s32 %v96_v33, %v93_v35  ;;  %v106_v40 = vsub.s32 %v103_v34, %v93_v35  ;;  %vm158_vm6 = vcmask 261120  }
  0x15   :  { %74 = vadd.xlane.f32.xlu1 %v73_v10  ;;  %379 = vmatpush3.msra.mxu0 %v150_v25  ;;  %v113_v45 = vsub.s32 %v110_v39, %v93_v35  ;;  %v233_v2 = vld [vmem:[%s523_s3] sm:$0xff]  ;;  %vm241_vm7 = vcmask 64512   ;;  %v455_v15 = vmov 1966171168   ;;  %vm346_vm8 = vcmask 253952  }
  0x16   :  { %62 = vadd.xlane.f32.xlu0 %v61_v11  ;;  %380 = vmatprep.subr.mxu0 %v453_v24  ;;  %v41_v60 = vld [vmem:[#allocation2] sm:$0x3] }
  0x17   :  { %381 = vmatpush3.msra.mxu0 %v149_v26  ;;  %390 = vmatpush3.msra.mxu1 %v233_v2  ;;  %v366_v3 = vld [vmem:[%s522_s2] ss:$0 sm:$0xff]  ;;  %s456_s2 = smov [#allocation6]  }
  0x18   :  { %382 = vmatprep.subr.mxu0 %v453_v24  ;;  %v368_v8 = vld [vmem:[%s524_s4] ss:$0 sm:$0xff]  ;;  %s354_s3 = sshll.u32 %s456_s2, 4  ;;  %s355_s3 = int_to_ptr.vmem [resolvable:$true] %s354_s3 }
  0x19   :  { %77 = vadd.xlane.f32.xlu1 %v76_v16  ;;  %383 = vmatpush3.msra.mxu0 %v148_v27  ;;  %v323_v16 = vunpack.c.l.s4 %v455_v15  ;;  %s426_s4 = scalar_lea.vmem %s355_s3, 32  ;;  %p431_p6 = scmp.lt.s32.totalorder %s355_s3, %s355_s3 }
  0x1a   :  { %65 = vadd.xlane.f32.xlu0 %v64_v17  ;;  %384 = vmatprep.subr.mxu0 %v453_v24  ;;  %p427_p5 = scmp.ne.s32.totalorder %s355_s3, %s426_s4  ;;  %p432_p7 = scmp.lt.s32.totalorder %s426_s4, %s426_s4 }
  0x1b   :  { %385 = vmatpush3.msra.mxu0 %v147_v28  ;;  %v324_v17 = vunpack.c.0.s8 %v323_v16 }
  0x1c   :  { %p433_p8 = por %p432_p7, %p431_p6 }
  0x1d   :  { %80 = vadd.xlane.f32.xlu1 %v79_v22  ;;  %v327_v18 = vsub.s32 %v324_v17, %v93_v35 }
  0x1e   :  { %68 = vadd.xlane.f32.xlu0 %v67_v23  ;;  %p434_p9 = pnand %p433_p8, %p427_p5 }
  0x9a   :  { %v72_v31 = vpop.xlane.xlu1 %71 }
  0x9b   :  { %v60_v32 = vpop.xlane.xlu0 %59  ;;  %v120_v48 = vrot.slane %v72_v31, %v94_v41 }
  0x9c   :  { %v95_v50 = vrot.slane %v60_v32, %v94_v41 }
  0x9e   :  { %v75_v36 = vpop.xlane.xlu1 %74 }
  0x9f   :  { %v63_v38 = vpop.xlane.xlu0 %62  ;;  %v124_v43 = vrot.slane %v75_v36, %v99_v37 }
  0xa0   :  { %v100_v46 = vrot.slane %v63_v38, %v99_v37 }
  0xa1   :  { %v125_v52 = vsel %vm101_vm2, %v124_v43, %v120_v48 }
  0xa2   :  { %v78_v42 = vpop.xlane.xlu1 %77  ;;  %v102_v55 = vsel %vm101_vm2, %v100_v46, %v95_v50 }
  0xa3   :  { %v66_v44 = vpop.xlane.xlu0 %65  ;;  %v129_v47 = vrot.slane %v78_v42, %v106_v40 }
  0xa4   :  { %v107_v49 = vrot.slane %v66_v44, %v106_v40 }
  0xa5   :  { %v130_v56 = vsel %vm108_vm3, %v129_v47, %v125_v52 }
  0xa6   :  { %v81_v51 = vpop.xlane.xlu1 %80  ;;  %v109_v58 = vsel %vm108_vm3, %v107_v49, %v102_v55 }
  0xa7   :  { %v134_v53 = vrot.slane %v81_v51, %v113_v45  ;;  %v69_v54 = vpop.xlane.xlu0 %68 }
  0xa8   :  { %v114_v57 = vrot.slane %v69_v54, %v113_v45 }
  0xa9   :  { %v135_v59 = vsel %vm115_vm4, %v134_v53, %v130_v56 }
  0xaa   :  { %v116_v61 = vsel %vm115_vm4, %v114_v57, %v109_v58 }
  0xab   :  { %v137_v62 = vsel %vm136_vm5, %v135_v59, %v116_v61 }
  0xac   :  { %v139_v63 = vadd.f32 %v137_v62, %v41_v60 }
  0xae   :  { %141 = vst.msk [vmem:[#allocation2] sm:$0x3] %vm39_vm0, %v139_v63 }
  0xb5   :  { %v145_v0 = vld [vmem:[#allocation2] sm:$0x3] }
  0xb6   :  { %v146_v1 = vmul.f32 0.00390625, %v145_v0 }
  0xb8   :  { %387 = vmatmul.mubr.msk.f32.vlgmr.msra.gmra.mxu0 %vm158_vm6, %v146_v1 }
 0x178   :  { %v228_v4 = vpop.f32.mrf.mxu0 }
 0x179   :  { %v229_v5 = vadd.f32 %v366_v3, %v228_v4 }
 0x17a   :  { %v388_v6 = vpop.f32.mrf.mxu0 }
 0x17b   :  { %v232_v7 = vmax.f32 %v229_v5, 0.0 }
 0x17d   :  { %392 = vmatmul.mubr.msk.f32.vlgmr.msra.gmra.mxu1 %vm241_vm7, %v232_v7 }
 0x23d   :  { %v311_v9 = vpop.f32.mrf.mxu1 }
 0x23e   :  { %v312_v10 = vadd.f32 %v368_v8, %v311_v9 }
 0x23f   :  { %v393_v11 = vpop.f32.mrf.mxu1 }
 0x240   :  { %v370_v12 = vmul.f32 -1.442695, %v312_v10 }
 0x242   :  { %402 = vpow2.f32 %v370_v12 }
 0x24f   :  { %v403_v13 = vpop.eup %402 }
 0x250   :  { %v318_v14 = vadd.f32 1.0, %v403_v13 }
 0x252   :  { %404 = vrcp.f32 %v318_v14 }
 0x25f   :  { %v405_v19 = vpop.eup %404 }
 0x260   :  { %v328_v20 = vrot.slane %v405_v19, %v327_v18 }
 0x262   :  { %v329_v21 = vcombine.high %v328_v20, %v328_v20  ;;  %v336_v22 = vrot.slane %v328_v20, %v327_v18 }
 0x264   :  { %v343_v23 = vrot.slane %v329_v21, %v327_v18  ;;  %347 = vst.msk [vmem:[#allocation6] sm:$0x1] %vm346_vm8, %v336_v22 }
 0x266   :  { %348 = vst.msk [vmem:[#allocation6 + $0x1] sm:$0x1] %vm346_vm8, %v343_v23 }
 0x267   :  { %437 = shalt.err (!%p434_p9)
}
 0x268   :  { %s457_s12 = smov 1  }
 0x269   :  { %360 = dma.vmem_to_hbm [thread:$0]  %s355_s3, 32, %s525_s5, [#allocation5], %s452_s22, %s452_s22, %s457_s12  }
 0x26a   :  { %448 = dma.done.wait [#allocation5], 32  }
 0x26b   :  { %449 = vsyncadd [#allocation5], 4294967264 }
 0x26c   :  { %364 = vsyncpa [#allocation4], 1 }
 0x26d   :  { %365 = vsyncpa [#allocation5], 1 }

</bundles_post_ra>
